<compile_context>
chip_gen: v6e
topology: v6e:2x2x1
jax: 0.10.0
libtpu: 0.0.40
codegen_flags: <defaults>
</compile_context>

<pallas_src>
import jax
import jax.numpy as jnp
from jax.experimental import pallas as pl
from jax.experimental.pallas import tpu as pltpu


def _round_up(n, m):
    return ((n + m - 1) // m) * m


# ----------------------------------------------------------------------------
# Kernels.  tail_ref is a (hidden, 4) buffer: [:,0]=b1, [:,1]=b2,
# [0,2]=b3 (scalar), [:,3]=w3 row.
# ----------------------------------------------------------------------------

def _mlp_kernel_features_major(x_ref, w1_ref, w2_ref, tail_ref, o_ref):
    # x_ref: (in_features, TB)  -- lane-dense.
    # Layer 1: (H, in) . (in, TB) -> (H, TB)   plain NN matmul on the MXU.
    h1 = jnp.dot(w1_ref[...], x_ref[...], preferred_element_type=jnp.float32)
    h1 = jnp.maximum(h1 + tail_ref[:, 0:1], 0.0)                 # bias + ReLU (VPU)

    # Layer 2: (H, H) . (H, TB) -> (H, TB)
    h2 = jnp.dot(w2_ref[...], h1, preferred_element_type=jnp.float32)
    h2 = jnp.maximum(h2 + tail_ref[:, 1:2], 0.0)                 # bias + ReLU (VPU)

    # Layer 3 on VPU + XLU (no 1-row MXU matmul): broadcast mul + sublane reduce.
    logits = jnp.sum(tail_ref[:, 3:4] * h2, axis=0, keepdims=True) + tail_ref[0:1, 2:3]
    o_ref[...] = jax.nn.sigmoid(logits)                          # EUP exp + VPU


def _mlp_kernel_batch_major(x_ref, w1_ref, w2_ref, tail_ref, o_ref):
    # x_ref: (TB, in_features)  -- torch-native layout (lane-padded in VMEM).
    # Layer 1: (H, in) . (TB, in)^T -> (H, TB)  NT contraction on the MXU.
    h1 = jax.lax.dot_general(
        w1_ref[...], x_ref[...],
        dimension_numbers=(((1,), (1,)), ((), ())),
        preferred_element_type=jnp.float32,
    )
    h1 = jnp.maximum(h1 + tail_ref[:, 0:1], 0.0)

    h2 = jnp.dot(w2_ref[...], h1, preferred_element_type=jnp.float32)
    h2 = jnp.maximum(h2 + tail_ref[:, 1:2], 0.0)

    logits = jnp.sum(tail_ref[:, 3:4] * h2, axis=0, keepdims=True) + tail_ref[0:1, 2:3]
    o_ref[...] = jax.nn.sigmoid(logits)


# ----------------------------------------------------------------------------
# Wrapper.
# ----------------------------------------------------------------------------

def pack_tail_params(b1, b2, w3, b3):
    """Pack the three biases and the fc3 weight row into one (hidden, 4) buffer.

    Single jnp.stack (no scatter chain); callers can precompute/cache this.
    """
    hidden = b1.shape[0]
    col_b3 = jnp.zeros((hidden,), jnp.float32).at[0].set(
        jnp.asarray(b3, jnp.float32).reshape(-1)[0])
    return jnp.stack(
        [b1.astype(jnp.float32),
         b2.astype(jnp.float32),
         col_b3,
         w3.astype(jnp.float32).reshape(hidden)],
        axis=1,
    )


def embedding_net_forward(x, w1, b1, w2, b2, w3, b3, *,
                          block_b=4096, features_major=False, tail=None):
    """Fused MLP forward.

    x : (B, 2*dim) float32  if features_major=False (torch Linear layout), or
        (2*dim, B) float32  if features_major=True  (lane-dense, preferred when
        the producer can emit it that way; no wrapper-side transpose is done).
    w1: (hidden, 2*dim),  b1: (hidden,)   -- torch-native (out_features, in_features)
    w2: (hidden, hidden), b2: (hidden,)
    w3: (1, hidden),      b3: (1,)
    tail: optional precomputed pack_tail_params(b1, b2, w3, b3)
    returns (B, 1) float32
    """
    if tail is None:
        tail = pack_tail_params(b1, b2, w3, b3)

    if features_major:
        in_features, batch = x.shape
    else:
        batch, in_features = x.shape
    hidden = w1.shape[0]

    # Batch tile: lane-aligned (multiple of 128), large (amortizes the ~0.35us
    # per-grid-step cost).  Ragged last tile handled by Pallas edge clipping.
    tb = min(block_b, _round_up(batch, 128))
    # Keep >= 2 grid steps when possible so v7x's two TensorCores both get work.
    if pl.cdiv(batch, tb) < 2 and tb > 128:
        tb = max(128, _round_up(tb // 2, 128))
    grid = (pl.cdiv(batch, tb),)

    if features_major:
        kernel = _mlp_kernel_features_major
        x_spec = pl.BlockSpec((in_features, tb), lambda i: (0, i))   # lane-dense x
    else:
        kernel = _mlp_kernel_batch_major
        x_spec = pl.BlockSpec((tb, in_features), lambda i: (i, 0))   # torch-native x

    out = pl.pallas_call(
        kernel,
        out_shape=jax.ShapeDtypeStruct((1, batch), jnp.float32),
        grid=grid,
        in_specs=[
            x_spec,                                                  # x: streamed / double-buffered
            pl.BlockSpec((hidden, in_features), lambda i: (0, 0)),   # w1: resident
            pl.BlockSpec((hidden, hidden), lambda i: (0, 0)),        # w2: resident
            pl.BlockSpec((hidden, 4), lambda i: (0, 0)),             # packed biases + w3 row: resident
        ],
        out_specs=pl.BlockSpec((1, tb), lambda i: (0, i)),           # lane-dense output slab
        compiler_params=pltpu.CompilerParams(
            dimension_semantics=("parallel",),
            # 48 MiB: above v5e's 16 MiB scoped default (unlocks the large
            # tile there), <= v6e/v7x physical VMEM with headroom for compiler
            # scratch and double buffering on v7x's 64 MiB.
            vmem_limit_bytes=48 * 1024 * 1024,
        ),
    )(x, w1, w2, tail)

    return out.reshape(batch, 1)


def init_params(key, in_features, hidden_size):
    """Deterministic init mimicking torch.nn.Linear default (uniform +-1/sqrt(fan_in)).
    Weights are torch-native (out_features, in_features); biases are 1-D."""
    def linear(k, fan_in, fan_out):
        kw, kb = jax.random.split(k)
        bound = 1.0 / jnp.sqrt(jnp.float32(fan_in))
        w = jax.random.uniform(kw, (fan_out, fan_in), jnp.float32, -bound, bound)
        b = jax.random.uniform(kb, (fan_out,), jnp.float32, -bound, bound)
        return w, b

    k1, k2, k3 = jax.random.split(key, 3)
    w1, b1 = linear(k1, in_features, hidden_size)
    w2, b2 = linear(k2, hidden_size, hidden_size)
    w3, b3 = linear(k3, hidden_size, 1)
    return w1, b1, w2, b2, w3, b3


if __name__ == "__main__":
    # env obs dim = 4 -> input = 2*dim = 8, hidden_size = 32.
    dim = 4
    in_features = 2 * dim
    hidden_size = 32

    key = jax.random.PRNGKey(0)
    kx, kp = jax.random.split(key)
    params = init_params(kp, in_features, hidden_size)
    w1, b1, w2, b2, w3, b3 = params

    def reference(xv):
        h1 = jnp.maximum(xv @ w1.T + b1, 0.0)
        h2 = jnp.maximum(h1 @ w2.T + b2, 0.0)
        return jax.nn.sigmoid(h2 @ w3.T + b3)

    # jit so the tail packing is constant-folded / hoisted out of the call path.
    fwd_bm = jax.jit(lambda xv: embedding_net_forward(xv, *params))
    fwd_fm = jax.jit(lambda xv: embedding_net_forward(xv, *params, features_major=True))

    # 512: >= 2 aligned grid tiles (exercises pipelining + megacore split);
    # 37: ragged edge block.
    for batch in (512, 37):
        # Torch-native (B, 2*dim) layout.
        x = jax.random.normal(jax.random.fold_in(kx, batch),
                              (batch, in_features), dtype=jnp.float32)
        out = jax.block_until_ready(fwd_bm(x))
        ref = reference(x)
        assert out.shape == (batch, 1)
        assert jnp.allclose(out, ref, atol=1e-5, rtol=1e-5), \
            float(jnp.max(jnp.abs(out - ref)))

        # Lane-dense features-major (2*dim, B) layout, produced at the source.
        x_fm = jax.random.normal(jax.random.fold_in(kx, 1000 + batch),
                                 (in_features, batch), dtype=jnp.float32)
        out_fm = jax.block_until_ready(fwd_fm(x_fm))
        ref_fm = reference(x_fm.T)
        assert out_fm.shape == (batch, 1)
        assert jnp.allclose(out_fm, ref_fm, atol=1e-5, rtol=1e-5), \
            float(jnp.max(jnp.abs(out_fm - ref_fm)))

    print("KERNEL_OK")
</pallas_src>

<mosaic_0001>
module attributes {stable_mosaic.version = 11 : i64} {
  func.func @_mlp_kernel_batch_major(%arg0: i32, %arg1: memref<256x8xf32, #tpu.memory_space<vmem>>, %arg2: memref<32x8xf32, #tpu.memory_space<vmem>>, %arg3: memref<32x32xf32, #tpu.memory_space<vmem>>, %arg4: memref<32x4xf32, #tpu.memory_space<vmem>>, %arg5: memref<1x256xf32, #tpu.memory_space<vmem>>) attributes {dimension_semantics = [#tpu.dimension_semantics<parallel>], iteration_bounds = array<i64: 2>, scalar_prefetch = 0 : i64, scratch_operands = 0 : i64, tpu.core_type = #tpu.core_type<tc>, window_params = [{transform_indices = @transform_0, window_bounds = array<i64: 256, 8>}, {pipeline_mode = #tpu.pipeline_mode<synchronous>, transform_indices = @transform_1, window_bounds = array<i64: 32, 8>}, {pipeline_mode = #tpu.pipeline_mode<synchronous>, transform_indices = @transform_2, window_bounds = array<i64: 32, 32>}, {pipeline_mode = #tpu.pipeline_mode<synchronous>, transform_indices = @transform_3, window_bounds = array<i64: 32, 4>}, {transform_indices = @transform_4, window_bounds = array<i64: 1, 256>}]} {
    %c0 = arith.constant 0 : index
    %c0_0 = arith.constant 0 : index
    %0 = vector.load %arg2[%c0, %c0_0] : memref<32x8xf32, #tpu.memory_space<vmem>>, vector<32x8xf32>
    %c0_1 = arith.constant 0 : index
    %c0_2 = arith.constant 0 : index
    %1 = vector.load %arg1[%c0_1, %c0_2] : memref<256x8xf32, #tpu.memory_space<vmem>>, vector<256x8xf32>
    %cst = arith.constant dense<0.000000e+00> : vector<32x256xf32>
    %2 = tpu.matmul %0, %1, %cst {dimension_numbers = #tpu.dot_dimension_numbers<[1], [1], [0], [0], [0, 0, 1, 0], [], []>} : vector<32x8xf32>, vector<256x8xf32>, vector<32x256xf32> -> vector<32x256xf32>
    %c0_3 = arith.constant 0 : index
    %c0_4 = arith.constant 0 : index
    %3 = vector.load %arg4[%c0_3, %c0_4] : memref<32x4xf32, #tpu.memory_space<vmem>>, vector<32x1xf32>
    %4 = vector.broadcast %3 : vector<32x1xf32> to vector<32x256xf32>
    %5 = arith.addf %2, %4 : vector<32x256xf32>
    %cst_5 = arith.constant 0.000000e+00 : f32
    %6 = vector.broadcast %cst_5 : f32 to vector<32x256xf32>
    %7 = arith.maximumf %5, %6 : vector<32x256xf32>
    %c0_6 = arith.constant 0 : index
    %c0_7 = arith.constant 0 : index
    %8 = vector.load %arg3[%c0_6, %c0_7] : memref<32x32xf32, #tpu.memory_space<vmem>>, vector<32x32xf32>
    %cst_8 = arith.constant dense<0.000000e+00> : vector<32x256xf32>
    %9 = tpu.matmul %8, %7, %cst_8 {dimension_numbers = #tpu.dot_dimension_numbers<[1], [0], [0], [1], [0, 0, 1, 1], [], []>} : vector<32x32xf32>, vector<32x256xf32>, vector<32x256xf32> -> vector<32x256xf32>
    %c0_9 = arith.constant 0 : index
    %c1 = arith.constant 1 : index
    %10 = vector.load %arg4[%c0_9, %c1] : memref<32x4xf32, #tpu.memory_space<vmem>>, vector<32x1xf32>
    %11 = vector.broadcast %10 : vector<32x1xf32> to vector<32x256xf32>
    %12 = arith.addf %9, %11 : vector<32x256xf32>
    %cst_10 = arith.constant 0.000000e+00 : f32
    %13 = vector.broadcast %cst_10 : f32 to vector<32x256xf32>
    %14 = arith.maximumf %12, %13 : vector<32x256xf32>
    %c0_11 = arith.constant 0 : index
    %c3 = arith.constant 3 : index
    %15 = vector.load %arg4[%c0_11, %c3] : memref<32x4xf32, #tpu.memory_space<vmem>>, vector<32x1xf32>
    %16 = vector.broadcast %15 : vector<32x1xf32> to vector<32x256xf32>
    %17 = arith.mulf %16, %14 : vector<32x256xf32>
    %cst_12 = arith.constant dense<0.000000e+00> : vector<256xf32>
    %18 = vector.multi_reduction <add>, %17, %cst_12 [0] : vector<32x256xf32> to vector<256xf32>
    %19 = vector.shape_cast %18 : vector<256xf32> to vector<1x256xf32>
    %c0_13 = arith.constant 0 : index
    %c2 = arith.constant 2 : index
    %20 = vector.load %arg4[%c0_13, %c2] : memref<32x4xf32, #tpu.memory_space<vmem>>, vector<1x1xf32>
    %21 = vector.broadcast %20 : vector<1x1xf32> to vector<1x256xf32>
    %22 = arith.addf %19, %21 : vector<1x256xf32>
    %23 = arith.negf %22 : vector<1x256xf32>
    %24 = math.exp %23 : vector<1x256xf32>
    %cst_14 = arith.constant 1.000000e+00 : f32
    %25 = vector.broadcast %cst_14 : f32 to vector<1x256xf32>
    %26 = arith.addf %25, %24 : vector<1x256xf32>
    %27 = arith.divf %25, %26 : vector<1x256xf32>
    %c0_15 = arith.constant 0 : index
    %c0_16 = arith.constant 0 : index
    %28 = vector.load %arg5[%c0_15, %c0_16] : memref<1x256xf32, #tpu.memory_space<vmem>>, vector<1x256xf32>
    tpu.vector_store %arg5[%c0_15, %c0_16], %27 {strides = array<i32>} : memref<1x256xf32, #tpu.memory_space<vmem>>, vector<1x256xf32>,
    return
  }
  func.func @transform_0(%arg0: i32) -> (i32, i32) {
    %c0_i32 = arith.constant 0 : i32
    %c0_i32_0 = arith.constant 0 : i32
    return %arg0, %c0_i32 : i32, i32
  }
  func.func @transform_1(%arg0: i32) -> (i32, i32) {
    %c0_i32 = arith.constant 0 : i32
    %c0_i32_0 = arith.constant 0 : i32
    %c0_i32_1 = arith.constant 0 : i32
    return %c0_i32, %c0_i32_0 : i32, i32
  }
  func.func @transform_2(%arg0: i32) -> (i32, i32) {
    %c0_i32 = arith.constant 0 : i32
    %c0_i32_0 = arith.constant 0 : i32
    %c0_i32_1 = arith.constant 0 : i32
    return %c0_i32, %c0_i32_0 : i32, i32
  }
  func.func @transform_3(%arg0: i32) -> (i32, i32) {
    %c0_i32 = arith.constant 0 : i32
    %c0_i32_0 = arith.constant 0 : i32
    %c0_i32_1 = arith.constant 0 : i32
    return %c0_i32, %c0_i32_0 : i32, i32
  }
  func.func @transform_4(%arg0: i32) -> (i32, i32) {
    %c0_i32 = arith.constant 0 : i32
    %c0_i32_0 = arith.constant 0 : i32
    return %c0_i32, %arg0 : i32, i32
  }
}

</mosaic_0001>

<bundles_post_ra>
// kernel: _lambda_.1
= control target key start
LH: loop header
LB: loop body
LE: loop exit
PB: predicated region body
PF: predicated region fallthrough
CT: control target
= control target key end

     0   :  { %9 = vsyncpa [#allocation3], 0  ;;  %s1230_s0 = inlined_call_operand.vmem [shape: f32[512,8], index: 0, kind: input, shape index: {}]   ;;  %s1231_s1 = inlined_call_operand.vmem [shape: f32[32,8], index: 1, kind: input, shape index: {}]   ;;  %s1232_s2 = inlined_call_operand.vmem [shape: f32[32,32], index: 2, kind: input, shape index: {}]   ;;  %s1233_s3 = inlined_call_operand.vmem [shape: f32[32,4], index: 3, kind: input, shape index: {}]   ;;  %s1234_s4 = inlined_call_operand.hbm [shape: f32[1,512], index: 4, kind: output, shape index: {}]  }
   0x1   :  { %11 = vsyncpa [#allocation3 + $0x1], 0  ;;  %s1003_s15 = smov 0   ;;  %s1005_s16 = smov 0  }
   0x2   :  { %s1007_s17 = smov 0   ;;  %s1009_s18 = smov 0  }
   0x3 LB: > { %s753_s19 = sadd.s32 4294967295, %s969_s18   ;;  %s754_s20 = sadd.s32 4294967294, %s969_s18   ;;  %s969_s18 = sphi %s1009_s18, %s1240_s18   ;;  %s965_s17 = sphi %s1007_s17, %s1239_s17   ;;  %s961_s16 = sphi %s1005_s16, %s1238_s16   ;;  %s957_s15 = sphi %s1003_s15, %s1237_s15  }
   0x4   : > { %s1026_s21 = sadd.s32 1, %s969_s18   ;;  %s113_s22 = sadd.s32 1, %s965_s17 }
   0x5   : > { %s110_s23 = ssub.s32 %s969_s18, %s1026_s21  ;;  %p123_p0 = scmp.ne.s32.totalorder %s965_s17, %s961_s16 }
   0x6   : > { %p111_p1 = scmp.eq.s32.totalorder %s110_s23, 0  ;;  %p124_p2 = scmp.eq.s32.totalorder %s753_s19, 1 }
   0x7   : > { %p129_p3 = scmp.ne.s32.totalorder %s961_s16, %s957_s15  ;;  %p130_p4 = scmp.eq.s32.totalorder %s754_s20, 1 }
   0x8   : > { %s1036_s24 = scalar_select %p111_p1, %s965_s17, %s113_s22  }
   0x9   : > { %p1038_p5 = por %p124_p2, %p123_p0  ;;  %p1042_p6 = por %p130_p4, %p129_p3 }
   0xa   : > { %p757_p7 = scmp.ge.s32.totalorder %s969_s18, 1  ;;  %p166_p8 = scmp.lt.s32.totalorder %s969_s18, 3 }
   0xc   : > { %p167_p9 = pnand %p757_p7, %p166_p8 }
   0xd   : > { %s1048_s27 = sshll.u32 (!%p167_p9), %s753_s19, 5 }
   0xe   : > { %170 = sbr.rel (%p167_p9) target bundleno = 587 (0x24b), region = 36  ;;  %p193_p10 = scmp.lt.s32.totalorder (!%p167_p9), %s1048_s27, 63 }
   0xf   : > { %s693_s5 = scalar_lea.hbm (!%p167_p9), %s1234_s4, %s1048_s27 }
  0x13   : > { %vm259_vm0 = vcmask 64512   ;;  %v1053_v0 = vld [vmem:[%s1231_s1] sm:$0xff]  ;;  %v971_v1 = vmov 0   ;;  %v1061_v2 = vld [vmem:[%s1233_s3 + $0x8] sm:$0xff]  ;;  %v1067_v3 = vld [vmem:[%s1233_s3 + $0x18] sm:$0xff]  ;;  %s194_s8 = scalar_select %p193_p10, %s1048_s27, 63 }
  0x14   : > { %841 = vmatprep.mubr.msk.f32.mxu0 %vm259_vm0, %v1053_v0  ;;  %895 = vset.pattern.permute.xlu1 %v971_v1  ;;  %v1073_v4 = vld [vmem:[%s1233_s3] sm:$0xff]  ;;  %v1079_v5 = vld [vmem:[%s1233_s3 + $0x10] sm:$0xff]  ;;  %v200_v38 = vld [vmem:[%s1231_s1 + $0x8] sm:$0xff]  ;;  %v972_v41 = vmov 0.0   ;;  %v973_v42 = vmov 1   ;;  %v974_v43 = vmov 3  }
  0x15   : > { %246 = vperm.xlu1 %895, %v1061_v2   ;;  %894 = vset.pattern.permute.xlu0 %v971_v1  ;;  %s760_s13 = sshll.u32 %s194_s8, 3  ;;  %v201_v39 = vld [vmem:[%s1231_s1 + $0x10] sm:$0xff]  ;;  %v202_v40 = vld [vmem:[%s1231_s1 + $0x18] sm:$0xff]  ;;  %v637_v44 = vld [vmem:[%s1233_s3] sm:$0x1]  ;;  %v975_v45 = vmov 2  }
  0x16   : > { %256 = vperm.xlu0 %894, %v1067_v3   ;;  %s1084_s20 = scalar_lea.vmem %s1230_s0, %s760_s13  ;;  %562 = vmatprep.mubr.f32.mxu1 %v972_v41  ;;  %vm485_vm1 = vcmask 261120   ;;  %s977_s8 = smov [#allocation2]  }
  0x17   : > { %v234_v6 = vld [vmem:[%s1084_s20 + $0xf8] sm:$0xff]  ;;  %v233_v8 = vld [vmem:[%s1084_s20 + $0xf0] sm:$0xff]  ;;  %v232_v10 = vld [vmem:[%s1084_s20 + $0xe8] sm:$0xff]  ;;  %s913_s9 = sshll.u32 %s977_s8, 4  ;;  %s914_s9 = int_to_ptr.vmem [resolvable:$false] %s913_s9 }
  0x18   : > { %v218_v7 = vld [vmem:[%s1084_s20 + $0x78] sm:$0xff]  ;;  %809 = vmatprep.subr.msk.mxu0 %vm259_vm0, %v234_v6  ;;  %v217_v9 = vld [vmem:[%s1084_s20 + $0x70] sm:$0xff]  ;;  %v216_v11 = vld [vmem:[%s1084_s20 + $0x68] sm:$0xff]  ;;  %s915_s10 = scalar_lea.vmem %s914_s9, 64 }
  0x19   : > { %241 = vperm.xlu1 %895, %v1073_v4   ;;  %810 = vmatpush3.xpose.msk.msra.mxu0 %vm259_vm0, %v218_v7  ;;  %v231_v12 = vld [vmem:[%s1084_s20 + $0xe0] sm:$0xff]  ;;  %v230_v14 = vld [vmem:[%s1084_s20 + $0xd8] sm:$0xff]  ;;  %v229_v16 = vld [vmem:[%s1084_s20 + $0xd0] sm:$0xff] }
  0x1a   : > { %251 = vperm.xlu0 %894, %v1079_v5   ;;  %811 = vmatprep.subr.msk.mxu0 %vm259_vm0, %v233_v8  ;;  %v215_v13 = vld [vmem:[%s1084_s20 + $0x60] sm:$0xff]  ;;  %v214_v15 = vld [vmem:[%s1084_s20 + $0x58] sm:$0xff]  ;;  %v213_v17 = vld [vmem:[%s1084_s20 + $0x50] sm:$0xff] }
  0x1b   : > { %v228_v18 = vld [vmem:[%s1084_s20 + $0xc8] sm:$0xff]  ;;  %v227_v20 = vld [vmem:[%s1084_s20 + $0xc0] sm:$0xff]  ;;  %v226_v22 = vld [vmem:[%s1084_s20 + $0xb8] sm:$0xff] }
  0x1c   : > { %v212_v19 = vld [vmem:[%s1084_s20 + $0x48] sm:$0xff]  ;;  %v211_v21 = vld [vmem:[%s1084_s20 + $0x40] sm:$0xff]  ;;  %v210_v23 = vld [vmem:[%s1084_s20 + $0x38] sm:$0xff] }
  0x1d   : > { %812 = vmatpush3.xpose.msk.msra.mxu0 %vm259_vm0, %v217_v9  ;;  %v225_v24 = vld [vmem:[%s1084_s20 + $0xb0] sm:$0xff]  ;;  %v224_v26 = vld [vmem:[%s1084_s20 + $0xa8] sm:$0xff]  ;;  %v223_v28 = vld [vmem:[%s1084_s20 + $0xa0] sm:$0xff]  ;;  %897 = vset.pattern.permute.xlu1 %v973_v42 }
  0x1e   : > { %813 = vmatprep.subr.msk.mxu0 %vm259_vm0, %v232_v10  ;;  %v209_v25 = vld [vmem:[%s1084_s20 + $0x30] sm:$0xff]  ;;  %v208_v27 = vld [vmem:[%s1084_s20 + $0x28] sm:$0xff]  ;;  %v207_v29 = vld [vmem:[%s1084_s20 + $0x20] sm:$0xff]  ;;  %896 = vset.pattern.permute.xlu0 %v973_v42 }
  0x1f   : > { %v222_v30 = vld [vmem:[%s1084_s20 + $0x98] sm:$0xff]  ;;  %v221_v32 = vld [vmem:[%s1084_s20 + $0x90] sm:$0xff]  ;;  %v220_v34 = vld [vmem:[%s1084_s20 + $0x88] sm:$0xff]  ;;  %474 = vperm.xlu1 %897, %v1061_v2   ;;  %470 = vperm.xlu0 %896, %v1073_v4  }
  0x20   : > { %v206_v31 = vld [vmem:[%s1084_s20 + $0x18] sm:$0xff]  ;;  %v205_v33 = vld [vmem:[%s1084_s20 + $0x10] sm:$0xff]  ;;  %v204_v35 = vld [vmem:[%s1084_s20 + $0x8] sm:$0xff] }
  0x21   : > { %814 = vmatpush3.xpose.msk.msra.mxu0 %vm259_vm0, %v216_v11  ;;  %v219_v36 = vld [vmem:[%s1084_s20 + $0x80] sm:$0xff]  ;;  %v466_v11 = vld [vmem:[%s1232_s2 + $0x8] sm:$0xff] }
  0x22   : > { %815 = vmatprep.subr.msk.mxu0 %vm259_vm0, %v231_v12  ;;  %v203_v37 = vld [vmem:[%s1084_s20] sm:$0xff]  ;;  %v467_v12 = vld [vmem:[%s1232_s2 + $0x10] sm:$0xff]  ;;  %s189_s20 = sand.u32 1, %s961_s16  }
  0x23   : > { %478 = vperm.xlu1 %897, %v1079_v5   ;;  %482 = vperm.xlu0 %896, %v1067_v3   ;;  %v465_v10 = vld [vmem:[%s1232_s2] sm:$0xff]  ;;  %s758_s22 = sshll.u32 %s189_s20, 1  ;;  %s681_s6 = scalar_lea.sflag [#allocation3], %s189_s20 }
  0x24   : > { %s191_s23 = scalar_lea.vmem [#allocation2], %s758_s22 }
  0x25   : > { %816 = vmatpush3.xpose.msk.msra.mxu0 %vm259_vm0, %v215_v13  ;;  %v468_v13 = vld [vmem:[%s1232_s2 + $0x18] sm:$0xff]  ;;  %s695_s28 = sshll.u32 %s191_s23, 4  ;;  %s696_s28 = int_to_ptr.vmem [resolvable:$true] %s695_s28 }
  0x26   : > { %817 = vmatprep.subr.msk.mxu0 %vm259_vm0, %v230_v14  ;;  %s909_s7 = scalar_lea.vmem %s696_s28, 32  ;;  %p916_p0 = scmp.lt.s32.totalorder %s696_s28, %s914_s9 }
  0x27   : > { %898 = vset.pattern.permute.xlu1 %v974_v43  ;;  %899 = vset.pattern.permute.xlu0 %v974_v43  ;;  %p910_p11 = scmp.ne.s32.totalorder %s696_s28, %s909_s7  ;;  %p917_p1 = scmp.lt.s32.totalorder %s915_s10, %s909_s7 }
  0x28   : > { %596 = vperm.xlu1 %898, %v1073_v4   ;;  %600 = vperm.xlu0 %899, %v1061_v2  }
  0x29   : > { %818 = vmatpush3.xpose.msk.msra.mxu0 %vm259_vm0, %v214_v15  ;;  %p911_p12 = pnand %p910_p11, %p1038_p5  ;;  %p918_p2 = por %p917_p1, %p916_p0 }
  0x2a   : > { %819 = vmatprep.subr.msk.mxu0 %vm259_vm0, %v229_v16 }
  0x2b   : > { %p912_p13 = pneg %p911_p12 }
  0x2c   : > { %604 = vperm.xlu1 %898, %v1079_v5   ;;  %900 = vset.pattern.permute.xlu0 %v975_v45 }
  0x2d   : > { %820 = vmatpush3.xpose.msk.msra.mxu0 %vm259_vm0, %v213_v17  ;;  %640 = vperm.xlu0 %900, %v637_v44   ;;  %p919_p3 = pnand %p918_p2, %p912_p13 }
  0x2e   : > { %821 = vmatprep.subr.msk.mxu0 %vm259_vm0, %v228_v18 }
  0x30   : > { %608 = vperm.xlu1 %898, %v1067_v3  }
  0x31   : > { %822 = vmatpush3.xpose.msk.msra.mxu0 %vm259_vm0, %v212_v19 }
  0x32   : > { %823 = vmatprep.subr.msk.mxu0 %vm259_vm0, %v227_v20 }
  0x35   : > { %824 = vmatpush3.xpose.msk.msra.mxu0 %vm259_vm0, %v211_v21 }
  0x36   : > { %825 = vmatprep.subr.msk.mxu0 %vm259_vm0, %v226_v22 }
  0x39   : > { %826 = vmatpush3.xpose.msk.msra.mxu0 %vm259_vm0, %v210_v23 }
  0x3a   : > { %827 = vmatprep.subr.msk.mxu0 %vm259_vm0, %v225_v24 }
  0x3d   : > { %828 = vmatpush3.xpose.msk.msra.mxu0 %vm259_vm0, %v209_v25 }
  0x3e   : > { %829 = vmatprep.subr.msk.mxu0 %vm259_vm0, %v224_v26 }
  0x41   : > { %830 = vmatpush3.xpose.msk.msra.mxu0 %vm259_vm0, %v208_v27 }
  0x42   : > { %831 = vmatprep.subr.msk.mxu0 %vm259_vm0, %v223_v28 }
  0x45   : > { %832 = vmatpush3.xpose.msk.msra.mxu0 %vm259_vm0, %v207_v29 }
  0x46   : > { %833 = vmatprep.subr.msk.mxu0 %vm259_vm0, %v222_v30 }
  0x49   : > { %834 = vmatpush3.xpose.msk.msra.mxu0 %vm259_vm0, %v206_v31 }
  0x4a   : > { %835 = vmatprep.subr.msk.mxu0 %vm259_vm0, %v221_v32 }
  0x4d   : > { %836 = vmatpush3.xpose.msk.msra.mxu0 %vm259_vm0, %v205_v33 }
  0x4e   : > { %837 = vmatprep.subr.msk.mxu0 %vm259_vm0, %v220_v34 }
  0x51   : > { %838 = vmatpush3.xpose.msk.msra.mxu0 %vm259_vm0, %v204_v35 }
  0x52   : > { %839 = vmatprep.subr.msk.mxu0 %vm259_vm0, %v219_v36 }
  0x55   : > { %840 = vmatpush3.xpose.msk.msra.mxu0 %vm259_vm0, %v203_v37 }
  0x58   : > { %842 = vmatmul.mubr.msk.f32.vlgmr.msra.gmra.mxu0 %vm259_vm0, %v1053_v0 }
  0x59   : > { %843 = vmatprep.mubr.msk.f32.mxu0 %vm259_vm0, %v200_v38 }
  0x5c   : > { %844 = vmatmul.mubr.msk.f32.gmra.mxu0 %vm259_vm0, %v200_v38 }
  0x5d   : > { %845 = vmatprep.mubr.msk.f32.mxu0 %vm259_vm0, %v201_v39 }
  0x60   : > { %846 = vmatmul.mubr.msk.f32.gmra.mxu0 %vm259_vm0, %v201_v39 }
  0x61   : > { %847 = vmatprep.mubr.msk.f32.mxu0 %vm259_vm0, %v202_v40 }
  0x64   : > { %848 = vmatmul.mubr.msk.f32.gmra.mxu0 %vm259_vm0, %v202_v40 }
  0x90   : > { %v247_v53 = vpop.permute.xlu1 %246 }
  0x91   : > { %v257_v50 = vpop.permute.xlu0 %256 }
  0x94   : > { %v242_v61 = vpop.permute.xlu1 %241 }
  0x95   : > { %v252_v55 = vpop.permute.xlu0 %251 }
  0x9a   : > { %v475_v14 = vpop.permute.xlu1 %474  ;;  %v471_v15 = vpop.permute.xlu0 %470 }
  0x9e   : > { %v479_v16 = vpop.permute.xlu1 %478  ;;  %v483_v19 = vpop.permute.xlu0 %482 }
  0xa3   : > { %v597_v21 = vpop.permute.xlu1 %596  ;;  %v601_v29 = vpop.permute.xlu0 %600 }
  0xa7   : > { %v605_v34 = vpop.permute.xlu1 %604 }
 0x118   : > { %v434_v46 = vpop.f32.mrf.mxu0 }
 0x119   : > { %v435_v4 = vadd.f32 %v434_v46, %v242_v61 }
 0x11a   : > { %v436_v47 = vpop.f32.mrf.mxu0 }
 0x11b   : > { %v437_v2 = vadd.f32 %v436_v47, %v242_v61  ;;  %v457_v9 = vmax.f32 %v435_v4, 0.0 }
 0x11c   : > { %v440_v48 = vpop.f32.mrf.mxu0 }
 0x11d   : > { %v441_v0 = vadd.f32 %v440_v48, %v247_v53  ;;  %v458_v8 = vmax.f32 %v437_v2, 0.0 }
 0x11e   : > { %v442_v49 = vpop.f32.mrf.mxu0 }
 0x11f   : > { %v443_v62 = vadd.f32 %v442_v49, %v247_v53  ;;  %v459_v7 = vmax.f32 %v441_v0, 0.0 }
 0x120   : > { %v446_v51 = vpop.f32.mrf.mxu0 }
 0x121   : > { %v447_v60 = vadd.f32 %v446_v51, %v252_v55  ;;  %v460_v6 = vmax.f32 %v443_v62, 0.0  ;;  %v609_v51 = vpop.permute.xlu1 %608 }
 0x122   : > { %v448_v52 = vpop.f32.mrf.mxu0 }
 0x123   : > { %v449_v58 = vadd.f32 %v448_v52, %v252_v55  ;;  %v461_v5 = vmax.f32 %v447_v60, 0.0 }
 0x124   : > { %v452_v54 = vpop.f32.mrf.mxu0 }
 0x125   : > { %v453_v56 = vadd.f32 %v452_v54, %v257_v50  ;;  %v462_v3 = vmax.f32 %v449_v58, 0.0 }
 0x126   : > { %v454_v57 = vpop.f32.mrf.mxu0 }
 0x127   : > { %v455_v59 = vadd.f32 %v454_v57, %v257_v50  ;;  %v463_v1 = vmax.f32 %v453_v56, 0.0 }
 0x129   : > { %v464_v63 = vmax.f32 %v455_v59, 0.0 }
 0x12b   : > { %522 = vmatprep.subr.mxu1 %v464_v63 }
 0x12c   : > { %523 = vmatpush1.msra.mxu1 %v463_v1 }
 0x12d   : > { %524 = vmatprep.subr.mxu1 %v462_v3 }
 0x12e   : > { %525 = vmatpush1.msra.mxu1 %v461_v5  ;;  %v641_v5 = vpop.permute.xlu0 %640 }
 0x12f   : > { %526 = vmatprep.subr.mxu1 %v460_v6 }
 0x130   : > { %527 = vmatpush1.msra.mxu1 %v459_v7 }
 0x131   : > { %528 = vmatprep.subr.mxu1 %v458_v8 }
 0x132   : > { %529 = vmatpush1.msra.mxu1 %v457_v9 }
 0x133   : > { %797 = vmatmul.mubr.msk.f32.vlgmr.msra.gmra.mxu1 %vm485_vm1, %v465_v10 }
 0x134   : > { %568 = vmatprep.mubr.f32.mxu1 %v972_v41 }
 0x137   : > { %798 = vmatmul.mubr.msk.f32.gmra.mxu1 %vm485_vm1, %v466_v11 }
 0x138   : > { %574 = vmatprep.mubr.f32.mxu1 %v972_v41 }
 0x13b   : > { %799 = vmatmul.mubr.msk.f32.gmra.mxu1 %vm485_vm1, %v467_v12 }
 0x13c   : > { %580 = vmatprep.mubr.f32.mxu1 %v972_v41 }
 0x13f   : > { %800 = vmatmul.mubr.msk.f32.gmra.mxu1 %vm485_vm1, %v468_v13 }
 0x1f3   : > { %v564_v17 = vpop.f32.mrf.mxu1 }
 0x1f4   : > { %v565_v20 = vadd.f32 %v564_v17, %v471_v15  ;;  %v976_v17 = vmov 1966171168  }
 0x1f5   : > { %v566_v18 = vpop.f32.mrf.mxu1 }
 0x1f6   : > { %v567_v24 = vadd.f32 %v566_v18, %v471_v15  ;;  %v587_v28 = vmax.f32 %v565_v20, 0.0  ;;  %v661_v18 = vunpack.c.l.s4 %v976_v17 }
 0x1f7   : > { %v570_v22 = vpop.f32.mrf.mxu1 }
 0x1f8   : > { %v571_v23 = vadd.f32 %v570_v22, %v475_v14  ;;  %v588_v33 = vmax.f32 %v567_v24, 0.0  ;;  %v611_v39 = vmul.f32 %v597_v21, %v587_v28  ;;  %v662_v20 = vunpack.c.0.s8 %v661_v18 }
 0x1f9   : > { %v572_v25 = vpop.f32.mrf.mxu1 }
 0x1fa   : > { %v589_v26 = vmax.f32 %v571_v23, 0.0  ;;  %v573_v27 = vadd.f32 %v572_v25, %v475_v14  ;;  %v612_v45 = vmul.f32 %v597_v21, %v588_v33 }
 0x1fb   : > { %v576_v30 = vpop.f32.mrf.mxu1 }
 0x1fc   : > { %v590_v31 = vmax.f32 %v573_v27, 0.0  ;;  %v577_v32 = vadd.f32 %v576_v30, %v479_v16  ;;  %v613_v36 = vmul.f32 %v601_v29, %v589_v26 }
 0x1fd   : > { %v578_v35 = vpop.f32.mrf.mxu1 }
 0x1fe   : > { %v591_v37 = vmax.f32 %v577_v32, 0.0  ;;  %v579_v38 = vadd.f32 %v578_v35, %v479_v16  ;;  %v614_v41 = vmul.f32 %v601_v29, %v590_v31  ;;  %v619_v47 = vadd.f32 %v613_v36, %v611_v39 }
 0x1ff   : > { %v582_v40 = vpop.f32.mrf.mxu1 }
 0x200   : > { %v615_v42 = vmul.f32 %v605_v34, %v591_v37  ;;  %v592_v43 = vmax.f32 %v579_v38, 0.0  ;;  %v583_v44 = vadd.f32 %v582_v40, %v483_v19  ;;  %v628_v52 = vadd.f32 %v614_v41, %v612_v45 }
 0x201   : > { %v584_v46 = vpop.f32.mrf.mxu1 }
 0x202   : > { %v616_v48 = vmul.f32 %v605_v34, %v592_v43  ;;  %v593_v49 = vmax.f32 %v583_v44, 0.0  ;;  %v585_v50 = vadd.f32 %v584_v46, %v483_v19  ;;  %v620_v53 = vadd.f32 %v619_v47, %v615_v42 }
 0x203   : > { %v663_v19 = vlaneseq }
 0x204   : > { %v617_v54 = vmul.f32 %v609_v51, %v593_v49  ;;  %v594_v55 = vmax.f32 %v585_v50, 0.0  ;;  %v629_v56 = vadd.f32 %v628_v52, %v616_v48 }
 0x205   : > { %v664_v21 = vshrl.u32 %v663_v19, 7  ;;  %vm677_vm2 = vcmp.lt.s32.totalorder %v663_v19, 256 }
 0x206   : > { %v621_v57 = vadd.f32 %v620_v53, %v617_v54  ;;  %v618_v58 = vmul.f32 %v609_v51, %v594_v55 }
 0x207   : > { %v665_v23 = vsub.s32 %v662_v20, %v664_v21 }
 0x208   : > { %v622_v59 = vrot.slane %v621_v57, 4  ;;  %v630_v60 = vadd.f32 %v629_v56, %v618_v58 }
 0x20a   : > { %v631_v61 = vrot.slane %v630_v60, 4  ;;  %v623_v62 = vadd.f32 %v622_v59, %v621_v57 }
 0x20c   : > { %v624_v63 = vrot.slane %v623_v62, 2  ;;  %v632_v0 = vadd.f32 %v631_v61, %v630_v60 }
 0x20e   : > { %v625_v1 = vadd.f32 %v624_v63, %v623_v62  ;;  %v633_v2 = vrot.slane %v632_v0, 2 }
 0x210   : > { %v626_v3 = vrot.slane %v625_v1, 1  ;;  %v634_v4 = vadd.f32 %v633_v2, %v632_v0 }
 0x212   : > { %v627_v6 = vadd.f32 %v626_v3, %v625_v1  ;;  %v635_v7 = vrot.slane %v634_v4, 1 }
 0x214   : > { %v636_v8 = vadd.f32 %v635_v7, %v634_v4  ;;  %v643_v9 = vadd.f32 %v641_v5, %v627_v6 }
 0x216   : > { %v644_v10 = vadd.f32 %v641_v5, %v636_v8  ;;  %v801_v11 = vmul.f32 -1.442695, %v643_v9 }
 0x218   : > { %901 = vpow2.f32 %v801_v11  ;;  %v802_v12 = vmul.f32 -1.442695, %v644_v10 }
 0x21a   : > { %903 = vpow2.f32 %v802_v12 }
 0x225   : > { %v902_v13 = vpop.eup %901 }
 0x226   : > { %v651_v14 = vadd.f32 1.0, %v902_v13 }
 0x227   : > { %v904_v15 = vpop.eup %903 }
 0x228   : > { %v652_v16 = vadd.f32 1.0, %v904_v15  ;;  %905 = vrcp.f32 %v651_v14 }
 0x22a   : > { %907 = vrcp.f32 %v652_v16 }
 0x235   : > { %v906_v22 = vpop.eup %905 }
 0x237   : > { %v908_v24 = vpop.eup %907 }
 0x238   : > { %v659_v25 = vcombine.low %v906_v22, %v908_v24 }
 0x23a   : > { %v666_v26 = vrot.slane %v659_v25, %v665_v23 }
 0x23c   : > { %v673_v27 = vrot.slane %v666_v26, %v665_v23 }
 0x23e   : > { %679 = vst.msk [vmem:[%s191_s23] sm:$0x3] %vm677_vm2, %v673_v27 }
 0x23f   : > { %922 = shalt.err (!%p919_p3)
}
 0x240   : > { %s923_s11 = scalar_lea.hbm %s693_s5, 32  ;;  %s927_s13 = scalar_lea.hbm %s1234_s4, 64 }
 0x241   : > { %p924_p4 = scmp.ne.s32.totalorder %s693_s5, %s923_s11  ;;  %p928_p9 = scmp.lt.s32.totalorder %s693_s5, %s1234_s4 }
 0x242   : > { %p929_p10 = scmp.lt.s32.totalorder %s927_s13, %s923_s11 }
 0x243   : > { %p925_p7 = pnand %p924_p4, %p1038_p5 }
 0x244   : > { %p930_p11 = por %p929_p10, %p928_p9 }
 0x245   : > { %p926_p8 = pneg %p925_p7 }
 0x247   : > { %p931_p12 = pnand %p930_p11, %p926_p8 }
 0x249   : > { %934 = shalt.err (!%p931_p12)
}
 0x24a   : > { %849 = dma.vmem_to_hbm [thread:$0]  (%p1038_p5), %s696_s28, 32, %s693_s5, %s681_s6  }
 0x24b PF: > { %p855_p13 = scmp.ge.s32.totalorder %s969_s18, 2  ;;  %s707_s20 = sand.u32 1, %s957_s15  }
 0x24c   : > { %s708_s22 = scalar_lea.sflag [#allocation3], %s707_s20 }
 0x24d   : > { %p852_p0 = pnand %p855_p13, %p1042_p6 }
 0x24f   : > { %p853_p1 = pneg %p852_p0 }
 0x251   : > { %952 = dma.done.wait (%p853_p1), %s708_s22, 32  }
 0x252   : > { %954 = vsyncadd (%p853_p1), %s708_s22, 4294967264  ;;  %p14_p2 = scmp.ge.s32.totalorder %s1026_s21, 4   ;;  %s1237_s15 = smov %s961_s16 }
 0x253   : > { %s1238_s16 = smov %s965_s17  ;;  %s1239_s17 = smov %s1036_s24 }
 0x254   : > { %s1240_s18 = smov %s1026_s21  ;;  %16 = sbr.rel (!%p14_p2) target bundleno = 3 (0x3), region = 71 }
 0x259   :  { %713 = vsyncpa [#allocation3], 1 }
 0x25a   :  { %715 = vsyncpa [#allocation3 + $0x1], 1 }

</bundles_post_ra>
